<compile_context>
chip_gen: v6e
topology: v6e:2x2x1
jax: 0.10.0
libtpu: 0.0.40
codegen_flags: <defaults>
</compile_context>

<pallas_src>
import functools

import jax
import jax.numpy as jnp
from jax.experimental import pallas as pl
from jax.experimental.pallas import tpu as pltpu

_LANE = 128


def _round_up(n, m):
    return (n + m - 1) // m * m


def _largest_divisor_chunk(total, target):
    """Largest multiple of 128 that divides `total` and is <= target."""
    th = min(target, total)
    th = max(_LANE, (th // _LANE) * _LANE)
    while total % th != 0:
        th -= _LANE
    return th


def _pad2d(a, rows, cols):
    pr, pc = rows - a.shape[0], cols - a.shape[1]
    if pr == 0 and pc == 0:
        return a
    return jnp.pad(a, ((0, pr), (0, pc)))


# -----------------------------------------------------------------------------
# Kernel bodies
# -----------------------------------------------------------------------------

def _ffn_resident_kernel(x_ref, w1_ref, b1_ref, w2_ref, b2_ref, o_ref, *, th):
    """Weight-resident path.  grid = (Mp // tm,).

    x_ref : (tm, Dp)   token tile
    w1_ref: (Dp, Hp)   whole W1 (constant index map -> fetched once)
    b1_ref: (1,  Hp)   whole b1 (f32)
    w2_ref: (Hp, Dp)   whole W2 (constant index map -> fetched once)
    b2_ref: (1,  Dp)   whole b2 (f32)
    o_ref : (tm, Dp)   output tile
    """
    x = x_ref[...]
    tm = x_ref.shape[0]
    Dp = o_ref.shape[1]
    Hp = w1_ref.shape[1]
    n_chunks = Hp // th  # static

    def chunk(j, acc):
        off = pl.multiple_of(j * th, _LANE)
        w1c = w1_ref[:, pl.ds(off, th)]
        b1c = b1_ref[:, pl.ds(off, th)]
        w2c = w2_ref[pl.ds(off, th), :]
        h = jnp.dot(x, w1c, preferred_element_type=jnp.float32)
        h = jnp.maximum(h + b1c, 0.0)      # bias + ReLU in f32
        # Dropout == identity (eval mode).
        return acc + jnp.dot(h.astype(w2c.dtype), w2c,
                             preferred_element_type=jnp.float32)

    acc = jnp.zeros((tm, Dp), jnp.float32)
    if n_chunks == 1:
        acc = chunk(0, acc)
    else:
        acc = jax.lax.fori_loop(0, n_chunks, chunk, acc,
                                unroll=bool(n_chunks <= 4))
    o_ref[...] = (acc + b2_ref[...]).astype(o_ref.dtype)


def _ffn_stream_kernel(x_ref, w1_ref, b1_ref, w2_ref, b2_ref, o_ref, acc_ref):
    """Streaming path (non-f32 output).  grid = (Mp // tm, Hp // th)."""
    h_step = pl.program_id(1)

    @pl.when(h_step == 0)
    def _init():
        acc_ref[...] = jnp.zeros_like(acc_ref)

    h = jnp.dot(x_ref[...], w1_ref[...], preferred_element_type=jnp.float32)
    h = jnp.maximum(h + b1_ref[...], 0.0)
    # Dropout == identity (eval mode).
    acc_ref[...] += jnp.dot(h.astype(w2_ref.dtype), w2_ref[...],
                            preferred_element_type=jnp.float32)

    @pl.when(h_step == pl.num_programs(1) - 1)
    def _finalize():
        o_ref[...] = (acc_ref[...] + b2_ref[...]).astype(o_ref.dtype)


def _ffn_stream_kernel_f32out(x_ref, w1_ref, b1_ref, w2_ref, b2_ref, o_ref):
    """Streaming path with an f32 output: the resident output tile is the
    accumulator (no scratch, no finalize copy)."""
    h_step = pl.program_id(1)

    @pl.when(h_step == 0)
    def _init():
        o_ref[...] = jnp.broadcast_to(b2_ref[...], o_ref.shape)  # seed with bias

    h = jnp.dot(x_ref[...], w1_ref[...], preferred_element_type=jnp.float32)
    h = jnp.maximum(h + b1_ref[...], 0.0)
    # Dropout == identity (eval mode).
    o_ref[...] += jnp.dot(h.astype(w2_ref.dtype), w2_ref[...],
                          preferred_element_type=jnp.float32)


# -----------------------------------------------------------------------------
# Hardware query + tile selection
# -----------------------------------------------------------------------------

@functools.lru_cache(maxsize=None)
def _chip_config():
    """Returns (generation tag, vmem_limit ceiling, per-core VMEM budget)."""
    kind = ""
    try:
        kind = jax.devices()[0].device_kind.lower()
    except Exception:  # pragma: no cover - defensive
        pass
    is_v5e = ("v5 lite" in kind) or ("v5e" in kind) or ("v5litepod" in kind)
    is_v7 = "v7" in kind
    gen = "v5e" if is_v5e else ("v7x" if is_v7 else "v6e")

    vmem_cap = None
    try:
        vmem_cap = int(pltpu.get_tpu_info().vmem_capacity_bytes)
    except Exception:  # pragma: no cover - fall back to generation defaults
        vmem_cap = None
    if vmem_cap is None or vmem_cap <= 0:
        vmem_cap = (64 if is_v7 else 128) << 20
    if is_v7:
        # Token axis is megacore-sharded ("parallel"); each of the 2 TCs needs
        # its own weight copy inside its 64 MiB VMEM.
        vmem_cap = min(vmem_cap, 64 << 20)

    cap_limit = int(vmem_cap * 0.90)            # ceiling for vmem_limit_bytes
    budget = int(vmem_cap * 0.70)               # tiling budget (headroom for
    return gen, cap_limit, budget               # Mosaic's internal scratch)


def _pick_tiles(M, Dp, Hp, itemsize, out_itemsize, out_is_f32, force_path):
    """Returns (resident, tm, th, Hp_final, vmem_limit_bytes)."""
    gen, cap_limit, budget = _chip_config()
    sublane_min = 16 if (itemsize < 4 or out_itemsize < 4) else 8

    def limit_for(footprint):
        return int(min(cap_limit, max(32 << 20, int(1.3 * footprint) + (8 << 20))))

    # ---------------- weight-resident fast path ------------------------------
    # Whole W1/W2 (+ double buffers) live in VMEM; re-read from HBM never
    # happens because their block index is constant over the token grid.
    weight_bytes = 2 * (2 * Dp * Hp) * itemsize + 2 * (Hp + Dp) * 4
    th_res = _largest_divisor_chunk(Hp, 512)

    def resident_vmem(tm_):
        io = 2 * tm_ * Dp * (itemsize + out_itemsize)       # x + out (dbl buffered)
        interm = tm_ * th_res * 4 + tm_ * Dp * 4             # f32 hidden chunk + acc
        return weight_bytes + io + interm

    want_resident = force_path != "stream" and (
        force_path == "resident" or resident_vmem(sublane_min) <= budget)

    if want_resident:
        tm = {"v5e": 256, "v6e": 512, "v7x": 512}[gen]
        tm = min(tm, _round_up(M, sublane_min))
        while tm > sublane_min and resident_vmem(tm) > budget:
            tm = max(sublane_min, _round_up(tm // 2, sublane_min))
        return True, tm, th_res, Hp, limit_for(resident_vmem(tm))

    # ---------------- streaming (h-tiled) path --------------------------------
    # Weights are re-read per token tile, so AI ~ 2*tm/itemsize flop/byte; pick
    # tm past each generation's ridge (v5e ~240, v6e ~660, v7x ~310 flop/B).
    tm = {"v5e": 256, "v6e": 1024, "v7x": 512}[gen]
    tm = min(tm, _round_up(M, sublane_min))

    th = min(1024, Hp)
    if gen == "v5e" and tm >= 256:
        th = min(th, 256)   # bound the (tm, th) f32 intermediate (vreg spills)
    th = max(_LANE, (th // _LANE) * _LANE)

    def stream_vmem(tm_, th_):
        tiles = 2 * ((tm_ * Dp + Dp * th_ + th_ * Dp) * itemsize
                     + (th_ + Dp) * 4
                     + tm_ * Dp * out_itemsize)
        interm = tm_ * th_ * 4
        acc = 0 if out_is_f32 else tm_ * Dp * 4
        return tiles + interm + acc

    while th > _LANE and stream_vmem(tm, th) > budget:
        th = max(_LANE, (th // 2 // _LANE) * _LANE)
    while tm > sublane_min and stream_vmem(tm, th) > budget:
        tm = max(sublane_min, _round_up(tm // 2, sublane_min))

    Hp_final = _round_up(Hp, th)
    return False, tm, th, Hp_final, limit_for(stream_vmem(tm, th))


# -----------------------------------------------------------------------------
# Public forward
# -----------------------------------------------------------------------------

@functools.partial(jax.jit, static_argnames=("compute_dtype", "force_path"))
def feed_forward(x, w1, b1, w2, b2, compute_dtype=jnp.bfloat16, force_path=None):
    """x: (..., D). w1: (D, H), b1: (H,), w2: (H, D), b2: (D,).

    compute_dtype: MXU input dtype (accumulation / bias adds stay f32).
    force_path: None (auto) | "resident" | "stream" (testing hook).
    """
    lead = x.shape[:-1]
    D = x.shape[-1]
    H = w1.shape[1]
    M = 1
    for s in lead:
        M *= s

    out_dtype = x.dtype
    itemsize = jnp.dtype(compute_dtype).itemsize
    out_itemsize = jnp.dtype(out_dtype).itemsize

    Dp = _round_up(D, _LANE)
    Hp = _round_up(H, _LANE)

    resident, tm, th, Hp, vmem_limit = _pick_tiles(
        M, Dp, Hp, itemsize, out_itemsize, out_dtype == jnp.float32, force_path)
    Mp = _round_up(M, tm)

    # Zero-pad only when needed (padded rows/cols contribute nothing: padded W1
    # columns + b1 entries are 0 so the padded hidden units are ReLU(0)=0).
    x2d = _pad2d(x.reshape(M, D).astype(compute_dtype), Mp, Dp)
    w1p = _pad2d(w1.astype(compute_dtype), Dp, Hp)
    w2p = _pad2d(w2.astype(compute_dtype), Hp, Dp)
    b1p = _pad2d(b1.reshape(1, H).astype(jnp.float32), 1, Hp)
    b2p = _pad2d(b2.reshape(1, D).astype(jnp.float32), 1, Dp)

    if resident:
        out2d = pl.pallas_call(
            functools.partial(_ffn_resident_kernel, th=th),
            out_shape=jax.ShapeDtypeStruct((Mp, Dp), out_dtype),
            grid_spec=pltpu.PrefetchScalarGridSpec(
                num_scalar_prefetch=0,
                grid=(Mp // tm,),
                in_specs=[
                    pl.BlockSpec((tm, Dp), lambda i: (i, 0)),   # x tile
                    pl.BlockSpec((Dp, Hp), lambda i: (0, 0)),   # W1 (resident)
                    pl.BlockSpec((1, Hp), lambda i: (0, 0)),    # b1
                    pl.BlockSpec((Hp, Dp), lambda i: (0, 0)),   # W2 (resident)
                    pl.BlockSpec((1, Dp), lambda i: (0, 0)),    # b2
                ],
                out_specs=pl.BlockSpec((tm, Dp), lambda i: (i, 0)),
            ),
            compiler_params=pltpu.CompilerParams(
                dimension_semantics=("parallel",),
                vmem_limit_bytes=vmem_limit,
            ),
        )(x2d, w1p, b1p, w2p, b2p)
    else:
        if out_dtype == jnp.float32:
            kernel = _ffn_stream_kernel_f32out
            scratch = []
        else:
            kernel = _ffn_stream_kernel
            scratch = [pltpu.VMEM((tm, Dp), jnp.float32)]
        out2d = pl.pallas_call(
            kernel,
            out_shape=jax.ShapeDtypeStruct((Mp, Dp), out_dtype),
            grid_spec=pltpu.PrefetchScalarGridSpec(
                num_scalar_prefetch=0,
                grid=(Mp // tm, Hp // th),
                in_specs=[
                    pl.BlockSpec((tm, Dp), lambda i, h: (i, 0)),   # x (resident over h)
                    pl.BlockSpec((Dp, th), lambda i, h: (0, h)),   # W1 column chunk
                    pl.BlockSpec((1, th), lambda i, h: (0, h)),    # b1 chunk
                    pl.BlockSpec((th, Dp), lambda i, h: (h, 0)),   # W2 row chunk
                    pl.BlockSpec((1, Dp), lambda i, h: (0, 0)),    # b2 (whole)
                ],
                out_specs=pl.BlockSpec((tm, Dp), lambda i, h: (i, 0)),
                scratch_shapes=scratch,
            ),
            compiler_params=pltpu.CompilerParams(
                dimension_semantics=("parallel", "arbitrary"),
                vmem_limit_bytes=vmem_limit,
            ),
        )(x2d, w1p, b1p, w2p, b2p)

    return out2d[:M, :D].reshape(*lead, D)


def init_params(key, d_model, hidden, dtype=jnp.float32):
    """Deterministic PyTorch-style init: U(-1/sqrt(fan_in), +1/sqrt(fan_in))."""
    k1, k2, k3, k4 = jax.random.split(key, 4)
    bound1 = 1.0 / (d_model ** 0.5)
    bound2 = 1.0 / (hidden ** 0.5)
    # nn.Linear stores weight as (out, in); we keep the math-friendly (in, out).
    w1 = jax.random.uniform(k1, (d_model, hidden), dtype, -bound1, bound1)
    b1 = jax.random.uniform(k2, (hidden,), dtype, -bound1, bound1)
    w2 = jax.random.uniform(k3, (hidden, d_model), dtype, -bound2, bound2)
    b2 = jax.random.uniform(k4, (d_model,), dtype, -bound2, bound2)
    return w1, b1, w2, b2


if __name__ == "__main__":
    d_model = 32
    hidden = 64
    batch, seq = 2, 8

    key = jax.random.PRNGKey(0)
    kx, kp = jax.random.split(key)
    x = jax.random.normal(kx, (batch, seq, d_model), dtype=jnp.float32)
    w1, b1, w2, b2 = init_params(kp, d_model, hidden)

    # Reference in plain JAX (dropout in eval mode == identity).
    hp = jax.lax.Precision.HIGHEST
    ref = jnp.maximum(jnp.dot(x.reshape(-1, d_model), w1, precision=hp) + b1, 0.0)
    ref = (jnp.dot(ref, w2, precision=hp) + b2).reshape(batch, seq, d_model)

    # 1) Default: bf16 MXU compute, weight-resident path.
    out_bf16 = jax.block_until_ready(feed_forward(x, w1, b1, w2, b2))
    assert out_bf16.shape == ref.shape and out_bf16.dtype == x.dtype
    assert jnp.allclose(out_bf16, ref, atol=1e-1, rtol=1e-1), "bf16 resident mismatch"

    # 2) f32 compute, weight-resident path: tight check.
    out_f32 = jax.block_until_ready(
        feed_forward(x, w1, b1, w2, b2, compute_dtype=jnp.float32))
    assert jnp.allclose(out_f32, ref, atol=1e-4, rtol=1e-4), "f32 resident mismatch"

    # 3) Streaming (h-tiled) path, f32 output accumulated in o_ref.
    out_stream = jax.block_until_ready(
        feed_forward(x, w1, b1, w2, b2, compute_dtype=jnp.float32,
                     force_path="stream"))
    assert jnp.allclose(out_stream, ref, atol=1e-4, rtol=1e-4), "f32 stream mismatch"

    # 4) Streaming path with bf16 output (exercises the f32 scratch accumulator).
    out_stream_bf16 = jax.block_until_ready(
        feed_forward(x.astype(jnp.bfloat16), w1, b1, w2, b2, force_path="stream"))
    assert jnp.allclose(out_stream_bf16.astype(jnp.float32), ref,
                        atol=1e-1, rtol=1e-1), "bf16 stream mismatch"

    print("KERNEL_OK")
</pallas_src>

<mosaic_0001>
module attributes {stable_mosaic.version = 11 : i64} {
  func.func @_ffn_resident_kernel(%arg0: i32, %arg1: memref<16x128xbf16, #tpu.memory_space<vmem>>, %arg2: memref<128x128xbf16, #tpu.memory_space<vmem>>, %arg3: memref<1x128xf32, #tpu.memory_space<vmem>>, %arg4: memref<128x128xbf16, #tpu.memory_space<vmem>>, %arg5: memref<1x128xf32, #tpu.memory_space<vmem>>, %arg6: memref<16x128xf32, #tpu.memory_space<vmem>>) attributes {dimension_semantics = [#tpu.dimension_semantics<parallel>], iteration_bounds = array<i64: 1>, scalar_prefetch = 0 : i64, scratch_operands = 0 : i64, tpu.core_type = #tpu.core_type<tc>, window_params = [{transform_indices = @transform_0, window_bounds = array<i64: 16, 128>}, {pipeline_mode = #tpu.pipeline_mode<synchronous>, transform_indices = @transform_1, window_bounds = array<i64: 128, 128>}, {pipeline_mode = #tpu.pipeline_mode<synchronous>, transform_indices = @transform_2, window_bounds = array<i64: 1, 128>}, {pipeline_mode = #tpu.pipeline_mode<synchronous>, transform_indices = @transform_3, window_bounds = array<i64: 128, 128>}, {pipeline_mode = #tpu.pipeline_mode<synchronous>, transform_indices = @transform_4, window_bounds = array<i64: 1, 128>}, {transform_indices = @transform_5, window_bounds = array<i64: 16, 128>}]} {
    %c0 = arith.constant 0 : index
    %c0_0 = arith.constant 0 : index
    %0 = vector.load %arg1[%c0, %c0_0] : memref<16x128xbf16, #tpu.memory_space<vmem>>, vector<16x128xbf16>
    %cst = arith.constant 0.000000e+00 : f32
    %1 = vector.broadcast %cst : f32 to vector<16x128xf32>
    %c0_i32 = arith.constant 0 : i32
    %2 = tpu.assume_multiple %c0_i32, 128 : i32
    %c0_1 = arith.constant 0 : index
    %3 = arith.index_cast %2 : i32 to index
    %4 = vector.load %arg2[%c0_1, %3] : memref<128x128xbf16, #tpu.memory_space<vmem>>, vector<128x128xbf16>
    %c0_2 = arith.constant 0 : index
    %5 = arith.index_cast %2 : i32 to index
    %6 = vector.load %arg3[%c0_2, %5] : memref<1x128xf32, #tpu.memory_space<vmem>>, vector<1x128xf32>
    %7 = arith.index_cast %2 : i32 to index
    %c0_3 = arith.constant 0 : index
    %8 = vector.load %arg4[%7, %c0_3] : memref<128x128xbf16, #tpu.memory_space<vmem>>, vector<128x128xbf16>
    %cst_4 = arith.constant dense<0.000000e+00> : vector<16x128xf32>
    %9 = tpu.matmul %0, %4, %cst_4 {dimension_numbers = #tpu.dot_dimension_numbers<[1], [0], [0], [1], [0, 0, 1, 1], [], []>} : vector<16x128xbf16>, vector<128x128xbf16>, vector<16x128xf32> -> vector<16x128xf32>
    %10 = vector.broadcast %6 : vector<1x128xf32> to vector<16x128xf32>
    %11 = arith.addf %9, %10 : vector<16x128xf32>
    %cst_5 = arith.constant 0.000000e+00 : f32
    %12 = vector.broadcast %cst_5 : f32 to vector<16x128xf32>
    %13 = arith.maximumf %11, %12 : vector<16x128xf32>
    %14 = arith.truncf %13 : vector<16x128xf32> to vector<16x128xbf16>
    %cst_6 = arith.constant dense<0.000000e+00> : vector<16x128xf32>
    %15 = tpu.matmul %14, %8, %cst_6 {dimension_numbers = #tpu.dot_dimension_numbers<[1], [0], [0], [1], [0, 0, 1, 1], [], []>} : vector<16x128xbf16>, vector<128x128xbf16>, vector<16x128xf32> -> vector<16x128xf32>
    %16 = arith.addf %1, %15 : vector<16x128xf32>
    %c0_7 = arith.constant 0 : index
    %c0_8 = arith.constant 0 : index
    %17 = vector.load %arg5[%c0_7, %c0_8] : memref<1x128xf32, #tpu.memory_space<vmem>>, vector<1x128xf32>
    %18 = vector.broadcast %17 : vector<1x128xf32> to vector<16x128xf32>
    %19 = arith.addf %16, %18 : vector<16x128xf32>
    %c0_9 = arith.constant 0 : index
    %c0_10 = arith.constant 0 : index
    %20 = vector.load %arg6[%c0_9, %c0_10] : memref<16x128xf32, #tpu.memory_space<vmem>>, vector<16x128xf32>
    tpu.vector_store %arg6[%c0_9, %c0_10], %19 {strides = array<i32>} : memref<16x128xf32, #tpu.memory_space<vmem>>, vector<16x128xf32>,
    return
  }
  func.func @transform_0(%arg0: i32) -> (i32, i32) {
    %c0_i32 = arith.constant 0 : i32
    %c0_i32_0 = arith.constant 0 : i32
    return %arg0, %c0_i32 : i32, i32
  }
  func.func @transform_1(%arg0: i32) -> (i32, i32) {
    %c0_i32 = arith.constant 0 : i32
    %c0_i32_0 = arith.constant 0 : i32
    %c0_i32_1 = arith.constant 0 : i32
    return %c0_i32, %c0_i32_0 : i32, i32
  }
  func.func @transform_2(%arg0: i32) -> (i32, i32) {
    %c0_i32 = arith.constant 0 : i32
    %c0_i32_0 = arith.constant 0 : i32
    %c0_i32_1 = arith.constant 0 : i32
    return %c0_i32, %c0_i32_0 : i32, i32
  }
  func.func @transform_3(%arg0: i32) -> (i32, i32) {
    %c0_i32 = arith.constant 0 : i32
    %c0_i32_0 = arith.constant 0 : i32
    %c0_i32_1 = arith.constant 0 : i32
    return %c0_i32, %c0_i32_0 : i32, i32
  }
  func.func @transform_4(%arg0: i32) -> (i32, i32) {
    %c0_i32 = arith.constant 0 : i32
    %c0_i32_0 = arith.constant 0 : i32
    %c0_i32_1 = arith.constant 0 : i32
    return %c0_i32, %c0_i32_0 : i32, i32
  }
  func.func @transform_5(%arg0: i32) -> (i32, i32) {
    %c0_i32 = arith.constant 0 : i32
    %c0_i32_0 = arith.constant 0 : i32
    return %arg0, %c0_i32 : i32, i32
  }
}

</mosaic_0001>

<bundles_post_ra>
// kernel: feed_forward.1
= control target key start
LH: loop header
LB: loop body
LE: loop exit
PB: predicated region body
PF: predicated region fallthrough
CT: control target
= control target key end

     0   :  { %v358_v0 = vmov 0.0   ;;  %vm359_vm0 = vmmov 0   ;;  %s453_s1 = inlined_call_operand.vmem [shape: bf16[128,128], index: 1, kind: input, shape index: {}]   ;;  %s454_s3 = inlined_call_operand.vmem [shape: bf16[128,128], index: 3, kind: input, shape index: {}]   ;;  %s455_s0 = inlined_call_operand.vmem [shape: bf16[16,128], index: 0, kind: input, shape index: {}]   ;;  %s456_s2 = inlined_call_operand.vmem [shape: f32[1,128], index: 2, kind: input, shape index: {}]   ;;  %s457_s4 = inlined_call_operand.vmem [shape: f32[1,128], index: 4, kind: input, shape index: {}]   ;;  %s458_s5 = inlined_call_operand.vmem [shape: f32[16,128], index: 5, kind: output, shape index: {}]  }
   0x1   :  { %299 = vmatprep.subr.bf16.mxu0 %v358_v0  ;;  %v341_v1 = vld [vmem:[%s453_s1 + $0x38] sm:$0xff]   ;;  %315 = vmatprep.mubr.msk.bf16.mxu0 %vm359_vm0, %v358_v0  ;;  %v342_v2 = vld [vmem:[%s453_s1 + $0x30] sm:$0xff]   ;;  %v343_v3 = vld [vmem:[%s453_s1 + $0x28] sm:$0xff]  }
   0x2   :  { %319 = vmatprep.subr.bf16.mxu1 %v358_v0  ;;  %335 = vmatprep.mubr.msk.bf16.mxu1 %vm359_vm0, %v358_v0  ;;  %v350_v4 = vld [vmem:[%s454_s3 + $0x38] sm:$0xff]   ;;  %v344_v5 = vld [vmem:[%s453_s1 + $0x20] sm:$0xff]   ;;  %v351_v6 = vld [vmem:[%s454_s3 + $0x30] sm:$0xff]  }
   0x3   :  { %300 = vmatpush3.bf16.msra.mxu0 %v341_v1  ;;  %320 = vmatpush3.bf16.msra.mxu1 %v350_v4  ;;  %v345_v7 = vld [vmem:[%s453_s1 + $0x18] sm:$0xff]   ;;  %v352_v8 = vld [vmem:[%s454_s3 + $0x28] sm:$0xff]   ;;  %v346_v9 = vld [vmem:[%s453_s1 + $0x10] sm:$0xff]  }
   0x4   :  { %301 = vmatprep.subr.bf16.mxu0 %v358_v0  ;;  %321 = vmatprep.subr.bf16.mxu1 %v358_v0  ;;  %v353_v10 = vld [vmem:[%s454_s3 + $0x20] sm:$0xff]   ;;  %v347_v11 = vld [vmem:[%s453_s1 + $0x8] sm:$0xff]   ;;  %v354_v12 = vld [vmem:[%s454_s3 + $0x18] sm:$0xff]  }
   0x5   :  { %v348_v13 = vld [vmem:[%s453_s1] sm:$0xff]   ;;  %v355_v15 = vld [vmem:[%s454_s3 + $0x10] sm:$0xff]   ;;  %v356_v16 = vld [vmem:[%s454_s3 + $0x8] sm:$0xff]  }
   0x6   :  { %v349_v14 = vld [vmem:[%s455_s0] sm:$0xff]  }
   0x7   :  { %302 = vmatpush3.bf16.msra.mxu0 %v342_v2  ;;  %322 = vmatpush3.bf16.msra.mxu1 %v351_v6  ;;  %v357_v17 = vld [vmem:[%s454_s3] sm:$0xff]  }
   0x8   :  { %303 = vmatprep.subr.bf16.mxu0 %v358_v0  ;;  %323 = vmatprep.subr.bf16.mxu1 %v358_v0  ;;  %v262_v18 = vld [vmem:[%s456_s2] ss:$0 sm:$0xff] }
   0x9   :  { %v272_v28 = vld [vmem:[%s457_s4] ss:$0 sm:$0xff] }
   0xb   :  { %304 = vmatpush3.bf16.msra.mxu0 %v343_v3  ;;  %324 = vmatpush3.bf16.msra.mxu1 %v352_v8 }
   0xc   :  { %305 = vmatprep.subr.bf16.mxu0 %v358_v0  ;;  %325 = vmatprep.subr.bf16.mxu1 %v358_v0 }
   0xf   :  { %306 = vmatpush3.bf16.msra.mxu0 %v344_v5  ;;  %326 = vmatpush3.bf16.msra.mxu1 %v353_v10 }
  0x10   :  { %307 = vmatprep.subr.bf16.mxu0 %v358_v0  ;;  %327 = vmatprep.subr.bf16.mxu1 %v358_v0 }
  0x13   :  { %308 = vmatpush3.bf16.msra.mxu0 %v345_v7  ;;  %328 = vmatpush3.bf16.msra.mxu1 %v354_v12 }
  0x14   :  { %309 = vmatprep.subr.bf16.mxu0 %v358_v0  ;;  %329 = vmatprep.subr.bf16.mxu1 %v358_v0 }
  0x17   :  { %310 = vmatpush3.bf16.msra.mxu0 %v346_v9  ;;  %330 = vmatpush3.bf16.msra.mxu1 %v355_v15 }
  0x18   :  { %311 = vmatprep.subr.bf16.mxu0 %v358_v0  ;;  %331 = vmatprep.subr.bf16.mxu1 %v358_v0 }
  0x1b   :  { %312 = vmatpush3.bf16.msra.mxu0 %v347_v11  ;;  %332 = vmatpush3.bf16.msra.mxu1 %v356_v16 }
  0x1c   :  { %313 = vmatprep.subr.bf16.mxu0 %v358_v0  ;;  %333 = vmatprep.subr.bf16.mxu1 %v358_v0 }
  0x1f   :  { %314 = vmatpush3.bf16.msra.mxu0 %v348_v13  ;;  %334 = vmatpush3.bf16.msra.mxu1 %v357_v17 }
  0x22   :  { %316 = vmatmul.mubr.bf16.vlgmr.msra.gmra.mxu0 %v349_v14 }
  0xe2   :  { %v150_v19 = vpop.f32.mrf.mxu0 }
  0xe3   :  { %v151_v21 = vadd.f32 %v262_v18, %v150_v19 }
  0xe4   :  { %v317_v20 = vpop.f32.mrf.mxu0 }
  0xe5   :  { %v157_v25 = vmax.f32 %v151_v21, 0.0 }
  0xe6   :  { %v153_v22 = vpop.f32.mrf.mxu0 }
  0xe7   :  { %v154_v23 = vadd.f32 %v262_v18, %v153_v22 }
  0xe8   :  { %v318_v24 = vpop.f32.mrf.mxu0 }
  0xe9   :  { %v158_v26 = vmax.f32 %v154_v23, 0.0 }
  0xeb   :  { %v159_v27 = vpack.c.bf16 %v158_v26, %v157_v25 }
  0xed   :  { %336 = vmatmul.mubr.bf16.vlgmr.msra.gmra.mxu1 %v159_v27 }
 0x1ad   :  { %v249_v29 = vpop.f32.mrf.mxu1 }
 0x1ae   :  { %v250_v30 = vadd.f32 %v272_v28, %v249_v29 }
 0x1af   :  { %v337_v31 = vpop.f32.mrf.mxu1 }
 0x1b0   :  { %256 = vst [vmem:[%s458_s5] sm:$0xff] %v250_v30 }
 0x1b1   :  { %v252_v32 = vpop.f32.mrf.mxu1 }
 0x1b2   :  { %v253_v33 = vadd.f32 %v272_v28, %v252_v32 }
 0x1b3   :  { %v338_v34 = vpop.f32.mrf.mxu1 }
 0x1b4   :  { %257 = vst [vmem:[%s458_s5 + $0x8] sm:$0xff] %v253_v33 }

</bundles_post_ra>
